<compile_context>
chip_gen: v6e
topology: v6e:2x2x1
jax: 0.10.0
libtpu: 0.0.40
codegen_flags: <defaults>
</compile_context>

<pallas_src>
import functools

import jax
import jax.numpy as jnp
from jax.experimental import pallas as pl
from jax.experimental.pallas import tpu as pltpu


def _layernorm_kernel(x_ref, g_ref, o_ref, *, eps, d_valid):
    """x_ref: (TB, Dp), g_ref: (1, Dp), o_ref: (TB, Dp).

    Dp is the lane-padded feature width; only the first `d_valid` lanes are
    real features (padding is zeros written by the wrapper).
    """
    x = x_ref[...].astype(jnp.float32)
    g = g_ref[...].astype(jnp.float32)          # (1, Dp), broadcasts over rows
    tb, dp = x.shape

    if d_valid == dp:
        mean = jnp.mean(x, axis=1, keepdims=True)
        xc = x - mean                                            # hoisted, reused
        var = jnp.mean(xc * xc, axis=1, keepdims=True)           # unbiased=False
    else:
        # Feature axis was zero-padded to a lane multiple: mask the reduction.
        lane = jax.lax.broadcasted_iota(jnp.int32, (tb, dp), dimension=1)
        valid = lane < d_valid
        inv_d = 1.0 / float(d_valid)
        mean = jnp.sum(x, axis=1, keepdims=True) * inv_d         # zero pad -> exact sum
        xc = jnp.where(valid, x - mean, 0.0)
        var = jnp.sum(xc * xc, axis=1, keepdims=True) * inv_d

    inv = jax.lax.rsqrt(jnp.maximum(var, eps))   # var.clamp(min=eps).rsqrt()
    o_ref[...] = (xc * inv * g).astype(o_ref.dtype)


def _round_up(a, m):
    return ((a + m - 1) // m) * m


def _pick_block_rows(n_rows, d_pad, itemsize):
    """Largest row tile that (a) keeps the double-buffered in+out tiles plus f32
    temporaries well inside every generation's VMEM budget (incl. v7x's 64 MiB),
    (b) respects the dtype's sublane packing, and (c) leaves >= 2 grid steps when
    the batch allows (v7x has 2 TensorCores per chip)."""
    packing = max(8, 32 // itemsize)                 # f32: 8, bf16: 16, 8-bit: 32
    bytes_per_row = d_pad * (4 * itemsize + 6 * 4)   # 2x(in+out) buffers + f32 temps
    budget = 28 * 1024 * 1024                        # conservative across v5e/v6e/v7x
    br = min(budget // bytes_per_row, 1024)          # gains flatten past ~512-1024 rows
    half = _round_up(pl.cdiv(n_rows, 2), packing)    # keep >= 2 grid steps if possible
    br = min(br, max(half, packing))
    br = max(packing, (br // packing) * packing)
    return int(br)


def layer_norm(x, g, *, block_rows=None):
    """x: (B, D), g: (D,).  Returns (B, D) with the reference LayerNorm applied."""
    B, D = x.shape
    assert g.shape == (D,)
    eps = 1e-5 if x.dtype == jnp.float32 else 1e-3   # inherited from the module spec
    itemsize = jnp.dtype(x.dtype).itemsize

    # Lane-dense feature axis: pad D up to a multiple of 128 with zeros so the
    # output writeback is unmasked; the reduction is masked inside the kernel.
    Dp = _round_up(D, 128)
    if Dp != D:
        x_in = jnp.pad(x, ((0, 0), (0, Dp - D)))
        g_in = jnp.pad(g, (0, Dp - D)).reshape(1, Dp)
    else:
        x_in = x
        g_in = g.reshape(1, Dp)

    if block_rows is None:
        block_rows = _pick_block_rows(B, Dp, itemsize)
    grid = (pl.cdiv(B, block_rows),)   # tail rows of the last block are masked by Pallas

    # Scoped-VMEM limit sized to the tiles (double-buffered in+out + f32 working set),
    # with headroom; stays well under v7x's 64 MiB physical VMEM.
    tile_elems = block_rows * Dp
    vmem_limit = int(min(48 << 20,
                         max(16 << 20, 4 * tile_elems * itemsize + 8 * tile_elems * 4)))

    kernel = functools.partial(_layernorm_kernel, eps=eps, d_valid=D)
    out = pl.pallas_call(
        kernel,
        out_shape=jax.ShapeDtypeStruct((B, Dp), x.dtype),
        grid_spec=pl.GridSpec(
            grid=grid,
            in_specs=[
                pl.BlockSpec((block_rows, Dp), lambda i: (i, 0)),
                pl.BlockSpec((1, Dp), lambda i: (0, 0)),   # constant index: g stays resident
            ],
            out_specs=pl.BlockSpec((block_rows, Dp), lambda i: (i, 0)),
        ),
        compiler_params=pltpu.CompilerParams(
            dimension_semantics=("parallel",),
            vmem_limit_bytes=vmem_limit,
        ),
    )(x_in, g_in)

    return out[:, :D] if Dp != D else out


def layer_norm_ref(x, g):
    eps = 1e-5 if x.dtype == jnp.float32 else 1e-3
    mean = jnp.mean(x, axis=1, keepdims=True)
    var = jnp.mean((x - mean) ** 2, axis=1, keepdims=True)
    return (x - mean) * jax.lax.rsqrt(jnp.maximum(var, eps)) * g


if __name__ == "__main__":
    key = jax.random.PRNGKey(0)
    B, D = 20, 32      # small demo; B deliberately not a multiple of the row tile
    kx, kg = jax.random.split(key)
    x = jax.random.normal(kx, (B, D), dtype=jnp.float32)
    # Parameter init matches nn.Parameter(torch.ones(dim)); perturb slightly so the
    # scale path is actually exercised (deterministic, in-script).
    g = jnp.ones((D,), dtype=jnp.float32) + 0.01 * jax.random.normal(kg, (D,), jnp.float32)

    out = layer_norm(x, g)
    jax.block_until_ready(out)

    ref = layer_norm_ref(x, g)
    assert out.shape == (B, D)
    assert jnp.allclose(out, ref, atol=1e-5, rtol=1e-5), "mismatch vs reference"
    print("KERNEL_OK")
</pallas_src>

<mosaic_0001>
module attributes {stable_mosaic.version = 11 : i64} {
  func.func @_layernorm_kernel(%arg0: i32, %arg1: memref<16x128xf32, #tpu.memory_space<vmem>>, %arg2: memref<1x128xf32, #tpu.memory_space<vmem>>, %arg3: memref<16x128xf32, #tpu.memory_space<vmem>>) attributes {dimension_semantics = [#tpu.dimension_semantics<parallel>], iteration_bounds = array<i64: 2>, scalar_prefetch = 0 : i64, scratch_operands = 0 : i64, tpu.core_type = #tpu.core_type<tc>, window_params = [{transform_indices = @transform_0, window_bounds = array<i64: 16, 128>}, {pipeline_mode = #tpu.pipeline_mode<synchronous>, transform_indices = @transform_1, window_bounds = array<i64: 1, 128>}, {transform_indices = @transform_2, window_bounds = array<i64: 16, 128>}]} {
    %c0 = arith.constant 0 : index
    %c0_0 = arith.constant 0 : index
    %0 = vector.load %arg1[%c0, %c0_0] : memref<16x128xf32, #tpu.memory_space<vmem>>, vector<16x128xf32>
    %c0_1 = arith.constant 0 : index
    %c0_2 = arith.constant 0 : index
    %1 = vector.load %arg2[%c0_1, %c0_2] : memref<1x128xf32, #tpu.memory_space<vmem>>, vector<1x128xf32>
    %2 = tpu.iota {dimensions = array<i32: 1>} : vector<16x128xi32>
    %c32_i32 = arith.constant 32 : i32
    %3 = vector.broadcast %c32_i32 : i32 to vector<16x128xi32>
    %4 = arith.cmpi slt, %2, %3 : vector<16x128xi32>
    %cst = arith.constant dense<0.000000e+00> : vector<16xf32>
    %5 = vector.multi_reduction <add>, %0, %cst [1] : vector<16x128xf32> to vector<16xf32>
    %6 = vector.shape_cast %5 : vector<16xf32> to vector<16x1xf32>
    %cst_3 = arith.constant 3.125000e-02 : f32
    %7 = vector.broadcast %cst_3 : f32 to vector<16x1xf32>
    %8 = arith.mulf %6, %7 : vector<16x1xf32>
    %9 = vector.broadcast %8 : vector<16x1xf32> to vector<16x128xf32>
    %10 = arith.subf %0, %9 : vector<16x128xf32>
    %cst_4 = arith.constant 0.000000e+00 : f32
    %11 = vector.broadcast %cst_4 : f32 to vector<16x128xf32>
    %12 = arith.select %4, %10, %11 : vector<16x128xi1>, vector<16x128xf32>
    %13 = arith.mulf %12, %12 : vector<16x128xf32>
    %cst_5 = arith.constant dense<0.000000e+00> : vector<16xf32>
    %14 = vector.multi_reduction <add>, %13, %cst_5 [1] : vector<16x128xf32> to vector<16xf32>
    %15 = vector.shape_cast %14 : vector<16xf32> to vector<16x1xf32>
    %cst_6 = arith.constant 3.125000e-02 : f32
    %16 = vector.broadcast %cst_6 : f32 to vector<16x1xf32>
    %17 = arith.mulf %15, %16 : vector<16x1xf32>
    %cst_7 = arith.constant 9.99999974E-6 : f32
    %18 = vector.broadcast %cst_7 : f32 to vector<16x1xf32>
    %19 = arith.maximumf %17, %18 : vector<16x1xf32>
    %20 = math.rsqrt %19 : vector<16x1xf32>
    %21 = vector.broadcast %20 : vector<16x1xf32> to vector<16x128xf32>
    %22 = arith.mulf %12, %21 : vector<16x128xf32>
    %23 = vector.broadcast %1 : vector<1x128xf32> to vector<16x128xf32>
    %24 = arith.mulf %22, %23 : vector<16x128xf32>
    %c0_8 = arith.constant 0 : index
    %c0_9 = arith.constant 0 : index
    %25 = vector.load %arg3[%c0_8, %c0_9] : memref<16x128xf32, #tpu.memory_space<vmem>>, vector<16x128xf32>
    tpu.vector_store %arg3[%c0_8, %c0_9], %24 {strides = array<i32>} : memref<16x128xf32, #tpu.memory_space<vmem>>, vector<16x128xf32>,
    return
  }
  func.func @transform_0(%arg0: i32) -> (i32, i32) {
    %c0_i32 = arith.constant 0 : i32
    %c0_i32_0 = arith.constant 0 : i32
    return %arg0, %c0_i32 : i32, i32
  }
  func.func @transform_1(%arg0: i32) -> (i32, i32) {
    %c0_i32 = arith.constant 0 : i32
    %c0_i32_0 = arith.constant 0 : i32
    %c0_i32_1 = arith.constant 0 : i32
    return %c0_i32, %c0_i32_0 : i32, i32
  }
  func.func @transform_2(%arg0: i32) -> (i32, i32) {
    %c0_i32 = arith.constant 0 : i32
    %c0_i32_0 = arith.constant 0 : i32
    return %arg0, %c0_i32 : i32, i32
  }
}

</mosaic_0001>

<bundles_post_ra>
// kernel: tpu_custom_call.1
= control target key start
LH: loop header
LB: loop body
LE: loop exit
PB: predicated region body
PF: predicated region fallthrough
CT: control target
= control target key end

     0   :  { %7 = vsyncpa [#allocation3], 0  ;;  %s671_s0 = inlined_call_operand.hbm [shape: f32[20,128], index: 0, kind: input, shape index: {}]   ;;  %s672_s1 = inlined_call_operand.vmem [shape: f32[1,128], index: 1, kind: input, shape index: {}]   ;;  %s673_s2 = inlined_call_operand.hbm [shape: f32[20,128], index: 2, kind: output, shape index: {}]  }
   0x1   :  { %9 = vsyncpa [#allocation3 + $0x1], 0 }
   0x2   :  { %10 = vsyncpa [#allocation4], 0 }
   0x3   :  { %12 = vsyncpa [#allocation4 + $0x1], 0  ;;  %s496_s9 = smov 0   ;;  %s498_s10 = smov 0  }
   0x4   :  { %s500_s11 = smov 0   ;;  %s502_s12 = smov 0  }
   0x5 LB: > { %s517_s13 = sadd.s32 4294967295, %s473_s12   ;;  %s311_s14 = sadd.s32 4294967294, %s473_s12   ;;  %s473_s12 = sphi %s502_s12, %s683_s12   ;;  %s469_s11 = sphi %s500_s11, %s682_s11   ;;  %s465_s10 = sphi %s498_s10, %s681_s10   ;;  %s461_s9 = sphi %s496_s9, %s680_s9  }
   0x6   : > { %s521_s15 = sadd.s32 1, %s473_s12   ;;  %s25_s16 = sadd.s32 1, %s469_s11 }
   0x7   : > { %s22_s17 = ssub.s32 %s473_s12, %s521_s15  ;;  %p32_p0 = scmp.ne.s32.totalorder %s469_s11, %s465_s10 }
   0x8   : > { %p23_p1 = scmp.eq.s32.totalorder %s22_s17, 0  ;;  %p33_p2 = scmp.eq.s32.totalorder %s473_s12, 0 }
   0x9   : > { %p38_p3 = scmp.ne.s32.totalorder %s465_s10, %s461_s9  ;;  %p39_p4 = scmp.eq.s32.totalorder %s517_s13, 0 }
   0xa   : > { %s533_s18 = scalar_select %p23_p1, %s469_s11, %s25_s16  }
   0xb   : > { %p34_p5 = por %p33_p2, %p32_p0  ;;  %p535_p6 = por %p39_p4, %p38_p3 }
   0xc   : > { %p83_p7 = scmp.eq.s32.totalorder %s517_s13, 1  ;;  %p89_p8 = scmp.eq.s32.totalorder %s311_s14, 1 }
   0xd   : > { %p674_p11 = scmp.ge.s32.totalorder %s473_s12, 2 }
   0xe   : > { %p540_p9 = por %p83_p7, %p32_p0  ;;  %p544_p10 = por %p89_p8, %p38_p3 }
   0xf   : > { %108 = sbr.rel (%p674_p11) target bundleno = 52 (0x34), region = 20 }
  0x10   : > { %s677_s21 = scalar_select %p544_p10, 1, 0 }
  0x14   : > { %111 = sbr.rel (!%p34_p5) target bundleno = 52 (0x34), region = 24  ;;  %s112_s22 = sand.u32 (%p34_p5), 1, %s469_s11  }
  0x15   : > { %s315_s23 = sshll.u32 (%p34_p5), %s473_s12, 1  ;;  %s314_s24 = sshll.u32 (%p34_p5), %s112_s22, 4 }
  0x16   : > { %s118_s25 = ssub.s32 (%p34_p5), 3, %s315_s23  ;;  %s556_s28 = scalar_lea.sflag (%p34_p5), [#allocation3], %s112_s22 }
  0x17   : > { %p119_p12 = scmp.lt.s32.totalorder (%p34_p5), %s118_s25, 2  ;;  %s116_s29 = scalar_lea.vmem (%p34_p5), [#allocation2], %s314_s24 }
  0x19   : > { %s685_s25 = smov (!%p119_p12, %s118_s25), 2 }
  0x1a   : > { %s553_s26 = sshll.u32 %s685_s25, 7 }
  0x1b   : > { %s123_s27 = ssub.s32 256, %s553_s26 }
  0x1c   : > { %124 = vsyncadd %s556_s28, %s123_s27  ;;  %p317_p13 = scmp.ne.s32.totalorder %s553_s26, 0  ;;  %s334_s30 = sshll.u32 %s473_s12, 8 }
  0x1d   : > { %s564_s5 = scalar_lea.hbm %s671_s0, %s334_s30  ;;  %s129_s6 = sshll.u32 %s116_s29, 4  ;;  %s566_s6 = int_to_ptr.vmem [resolvable:$true] %s129_s6 }
  0x1e   : > { %s383_s7 = scalar_lea.hbm %s564_s5, %s553_s26  ;;  %s387_s16 = scalar_lea.hbm %s671_s0, 384 }
  0x1f   : > { %p384_p0 = scmp.ne.s32.totalorder %s564_s5, %s383_s7  ;;  %p388_p3 = scmp.lt.s32.totalorder %s564_s5, %s671_s0 }
  0x20   : > { %p389_p4 = scmp.lt.s32.totalorder %s387_s16, %s383_s7 }
  0x21   : > { %p385_p1 = pnand %p384_p0, %p317_p13 }
  0x22   : > { %p390_p5 = por %p389_p4, %p388_p3 }
  0x23   : > { %p386_p2 = pneg %p385_p1 }
  0x25   : > { %p391_p7 = pnand %p390_p5, %p386_p2 }
  0x27   : > { %394 = shalt.err (!%p391_p7)
}
  0x28   : > { %s395_s23 = scalar_lea.vmem %s566_s6, %s553_s26  ;;  %s475_s24 = smov [#allocation2]  }
  0x29   : > { %p396_p8 = scmp.ne.s32.totalorder %s566_s6, %s395_s23  ;;  %s399_s25 = sshll.u32 %s475_s24, 4  ;;  %s400_s25 = int_to_ptr.vmem [resolvable:$false] %s399_s25 }
  0x2a   : > { %s401_s27 = scalar_lea.vmem %s400_s25, 512  ;;  %p402_p1 = scmp.lt.s32.totalorder %s566_s6, %s400_s25 }
  0x2b   : > { %p397_p12 = pnand %p396_p8, %p317_p13  ;;  %p403_p11 = scmp.lt.s32.totalorder %s401_s27, %s395_s23 }
  0x2d   : > { %p398_p0 = pneg %p397_p12  ;;  %p404_p10 = por %p403_p11, %p402_p1 }
  0x2f   : > { %p405_p3 = pnand %p404_p10, %p398_p0 }
  0x31   : > { %408 = shalt.err (!%p405_p3)
}
  0x32   : > { %s476_s29 = smov 128   ;;  %s477_s30 = smov 8  }
  0x33   : > { %135 = dma.hbm_to_vmem [thread:$0]  (%p317_p13), %s564_s5, %s553_s26, %s566_s6, %s556_s28, %s476_s29, %s476_s29, %s477_s30  }
  0x34 PF: > { %p321_p2 = scmp.ge.s32.totalorder %s473_s12, 1  ;;  %p137_p4 = scmp.lt.s32.totalorder %s473_s12, 3 }
  0x36   : > { %p138_p5 = pnand %p321_p2, %p137_p4 }
  0x37   : > { %s595_s3 = sand.u32 (!%p138_p5), 1, %s465_s10  }
  0x38   : > { %141 = sbr.rel (%p138_p5) target bundleno = 400 (0x190), region = 28  ;;  %s322_s4 = sshll.u32 (!%p138_p5), %s595_s3, 4 }
  0x39   : > { %s144_s7 = scalar_lea.sflag (!%p138_p5), [#allocation3], %s595_s3  ;;  %s147_s8 = scalar_lea.vmem (!%p138_p5), [#allocation2], %s322_s4 }
  0x3d   : > { %452 = dma.done.wait (%p535_p6), %s144_s7, 256  }
  0x3e   : > { %454 = vsyncadd (%p535_p6), %s144_s7, 4294967040  ;;  %v178_v0 = vld [vmem:[%s147_s8] sm:$0xff]  ;;  %v179_v1 = vld [vmem:[%s147_s8 + $0x8] sm:$0xff]  ;;  %v181_v2 = vlaneseq  ;;  %s167_s28 = scalar_lea.vmem [#allocation5], %s322_s4  ;;  %s219_s5 = scalar_lea.sflag [#allocation4], %s595_s3 }
  0x3f   : > { %184 = vadd.xlane.f32.xlu0 %v178_v0  ;;  %v324_v21 = vld [vmem:[%s672_s1] ss:$0 sm:$0xff]  ;;  %s326_s6 = sshll.u32 (%p540_p9), %s517_s13, 1 }
  0x40   : > { %v182_v3 = vand.u32 127, %v181_v2  ;;  %s227_s14 = ssub.s32 (%p540_p9), 3, %s326_s6 }
  0x41   : > { %p228_p6 = scmp.lt.s32.totalorder (%p540_p9), %s227_s14, 2 }
  0x42   : > { %vm183_vm0 = vcmp.lt.s32.totalorder %v182_v3, 32 }
  0x43   : > { %186 = vadd.xlane.f32.xlu0 %v179_v1 }
  0xc8   : > { %v185_v4 = vpop.xlane.xlu0 %184 }
  0xc9   : > { %v188_v5 = vmul.f32 0.03125, %v185_v4 }
  0xcb   : > { %v190_v6 = vsub.f32 %v178_v0, %v188_v5 }
  0xcc   : > { %v187_v7 = vpop.xlane.xlu0 %186 }
  0xcd   : > { %v189_v8 = vmul.f32 0.03125, %v187_v7  ;;  %v192_v9 = vsel %vm183_vm0, %v190_v6, 0.0 }
  0xce   : > { %v194_v10 = vmul.f32 %v192_v9, %v192_v9 }
  0xcf   : > { %v191_v11 = vsub.f32 %v179_v1, %v189_v8 }
  0xd0   : > { %196 = vadd.xlane.f32.xlu1 %v194_v10 }
  0xd1   : > { %v193_v12 = vsel %vm183_vm0, %v191_v11, 0.0 }
  0xd2   : > { %v195_v13 = vmul.f32 %v193_v12, %v193_v12 }
  0xd4   : > { %198 = vadd.xlane.f32.xlu1 %v195_v13 }
 0x159   : > { %v197_v14 = vpop.xlane.xlu1 %196 }
 0x15a   : > { %v200_v15 = vmul.f32 0.03125, %v197_v14 }
 0x15c   : > { %v202_v16 = vmax.f32 %v200_v15, 1e-05 }
 0x15d   : > { %v199_v17 = vpop.xlane.xlu1 %198 }
 0x15e   : > { %379 = vrsqrt.f32 %v202_v16  ;;  %v201_v18 = vmul.f32 0.03125, %v199_v17 }
 0x160   : > { %v203_v19 = vmax.f32 %v201_v18, 1e-05 }
 0x162   : > { %381 = vrsqrt.f32 %v203_v19 }
 0x16b   : > { %v380_v20 = vpop.eup %379 }
 0x16c   : > { %v206_v22 = vmul.f32 %v380_v20, %v192_v9 }
 0x16e   : > { %v214_v23 = vmul.f32 %v324_v21, %v206_v22 }
 0x16f   : > { %v382_v24 = vpop.eup %381 }
 0x170   : > { %216 = vst [vmem:[%s167_s28] sm:$0xff] %v214_v23  ;;  %v207_v25 = vmul.f32 %v382_v24, %v193_v12  ;;  %225 = sbr.rel (!%p540_p9) target bundleno = 400 (0x190), region = 36 }
 0x172   : > { %v215_v26 = vmul.f32 %v324_v21, %v207_v25 }
 0x174   : > { %217 = vst [vmem:[%s167_s28 + $0x8] sm:$0xff] %v215_v26 }
 0x175   : > { %s687_s14 = smov (!%p228_p6, %s227_s14), 2 }
 0x176   : > { %s614_s16 = sshll.u32 %s687_s14, 7 }
 0x177   : > { %s232_s17 = ssub.s32 256, %s614_s16 }
 0x178   : > { %233 = vsyncadd %s219_s5, %s232_s17  ;;  %p328_p10 = scmp.ne.s32.totalorder %s614_s16, 0  ;;  %s335_s22 = sshll.u32 %s517_s13, 8 }
 0x179   : > { %s624_s24 = scalar_lea.hbm %s673_s2, %s335_s22  ;;  %s238_s25 = sshll.u32 %s167_s28, 4  ;;  %s626_s25 = int_to_ptr.vmem [resolvable:$true] %s238_s25 }
 0x17a   : > { %s409_s27 = scalar_lea.vmem %s626_s25, %s614_s16  ;;  %s478_s29 = smov [#allocation5]  }
 0x17b   : > { %p410_p9 = scmp.ne.s32.totalorder %s626_s25, %s409_s27  ;;  %s413_s30 = sshll.u32 %s478_s29, 4  ;;  %s414_s30 = int_to_ptr.vmem [resolvable:$false] %s413_s30 }
 0x17c   : > { %s415_s13 = scalar_lea.vmem %s414_s30, 512  ;;  %p416_p7 = scmp.lt.s32.totalorder %s626_s25, %s414_s30 }
 0x17d   : > { %p411_p11 = pnand %p410_p9, %p328_p10  ;;  %p417_p8 = scmp.lt.s32.totalorder %s415_s13, %s409_s27 }
 0x17f   : > { %p412_p13 = pneg %p411_p11  ;;  %p418_p12 = por %p417_p8, %p416_p7 }
 0x181   : > { %p419_p0 = pnand %p418_p12, %p412_p13 }
 0x183   : > { %422 = shalt.err (!%p419_p0)
}
 0x184   : > { %s423_s4 = scalar_lea.hbm %s624_s24, %s614_s16  ;;  %s427_s19 = scalar_lea.hbm %s673_s2, 384 }
 0x185   : > { %p424_p1 = scmp.ne.s32.totalorder %s624_s24, %s423_s4  ;;  %p428_p4 = scmp.lt.s32.totalorder %s624_s24, %s673_s2 }
 0x186   : > { %p429_p5 = scmp.lt.s32.totalorder %s427_s19, %s423_s4 }
 0x187   : > { %p425_p3 = pnand %p424_p1, %p328_p10 }
 0x188   : > { %p430_p6 = por %p429_p5, %p428_p4 }
 0x189   : > { %p426_p2 = pneg %p425_p3 }
 0x18b   : > { %p431_p9 = pnand %p430_p6, %p426_p2 }
 0x18d   : > { %434 = shalt.err (!%p431_p9)
}
 0x18e   : > { %s479_s6 = smov 128   ;;  %s480_s14 = smov 8  }
 0x18f   : > { %244 = dma.vmem_to_hbm [thread:$0]  (%p328_p10), %s626_s25, %s614_s16, %s624_s24, %s219_s5, %s479_s6, %s479_s6, %s480_s14  }
 0x190 PF: > { %s253_s17 = sand.u32 1, %s461_s9   ;;  %p678_p11 = scmp.ne.s32.totalorder %s677_s21, 0 }
 0x191   : > { %p679_p13 = scmp.ge.s32.totalorder %s473_s12, 2  ;;  %s254_s22 = scalar_lea.sflag [#allocation4], %s253_s17 }
 0x193   : > { %p339_p7 = pnand %p679_p13, %p678_p11 }
 0x195   : > { %p340_p8 = pneg %p339_p7 }
 0x197   : > { %456 = dma.done.wait (%p340_p8), %s254_s22, 256  }
 0x198   : > { %458 = vsyncadd (%p340_p8), %s254_s22, 4294967040  ;;  %p15_p12 = scmp.ge.s32.totalorder %s521_s15, 4   ;;  %s680_s9 = smov %s465_s10 }
 0x199   : > { %s681_s10 = smov %s469_s11  ;;  %s682_s11 = smov %s533_s18 }
 0x19a   : > { %s683_s12 = smov %s521_s15  ;;  %17 = sbr.rel (!%p15_p12) target bundleno = 5 (0x5), region = 73 }
 0x19f   :  { %259 = vsyncpa [#allocation3], 1 }
 0x1a0   :  { %261 = vsyncpa [#allocation3 + $0x1], 1 }
 0x1a1   :  { %262 = vsyncpa [#allocation4], 1 }
 0x1a2   :  { %264 = vsyncpa [#allocation4 + $0x1], 1 }

</bundles_post_ra>
